<compile_context>
chip_gen: v7x
topology: tpu7x:2x2x1
jax: 0.10.0
libtpu: 0.0.40
codegen_flags: <defaults>
</compile_context>

<pallas_src>
import jax
import jax.numpy as jnp
from jax.experimental import pallas as pl
from jax.experimental.pallas import tpu as pltpu


def _pad_rows(n, mult):
    return ((n + mult - 1) // mult) * mult


def _vmem_bytes(shape, itemsize=4):
    """Bytes of a 32-bit array once padded to the (8, 128) vreg tile."""
    if len(shape) == 1:
        shape = (1, shape[0])
    lead = 1
    for d in shape[:-2]:
        lead *= d
    r = ((shape[-2] + 7) // 8) * 8
    c = ((shape[-1] + 127) // 128) * 128
    return lead * r * c * itemsize


# ---------------------------------------------------------------------------
# Kernel 1: fused projection + per-head scores.
#   rows = [x ; review]  (zero padded to a multiple of the row tile)
#   P = rows @ [W | Wskip]                          (bf16 in, f32 accumulate)
#   S = P @ [[A_src | A_trg | A_rev]; 0]            (block-diag scoring)
# ---------------------------------------------------------------------------
def proj_kernel(xr_ref, wcat_ref, acat_ref, p_ref, s_ref):
    p = jnp.dot(xr_ref[...], wcat_ref[...], preferred_element_type=jnp.float32)
    p_ref[...] = p
    s_ref[...] = jnp.dot(p, acat_ref[...], preferred_element_type=jnp.float32)


# ---------------------------------------------------------------------------
# Kernel 2: per-edge gather / neighborhood softmax / scatter-add.
#   src/trg indices in SMEM; all node/edge tables VMEM-resident accumulators.
# ---------------------------------------------------------------------------
def edge_kernel(src_ref, trg_ref, proj_ref, skip_ref, ssrc_ref, strg_ref,
                srev_ref, bias_ref, expand_ref, out_ref,
                exp_ref, att_ref, af_ref, bf_ref, denom_ref):
    E, _ = srev_ref.shape
    HF = proj_ref.shape[1]

    # Uniform softmax shift: upper bound on leakyReLU(score_per_edge) so every
    # exp() argument is <= 0.  (Softmax is shift invariant; only the 1e-16
    # epsilon term is perturbed relative to the exact-global-max reference.)
    shift = jnp.maximum(
        jnp.max(ssrc_ref[...]) + jnp.max(strg_ref[...]) + jnp.max(srev_ref[...]),
        0.0)

    denom_ref[...] = jnp.zeros_like(denom_ref)
    out_ref[...] = jnp.zeros_like(out_ref)

    # Pass 1: per-edge score -> exp -> scatter-add softmax denominator by trg.
    @pl.loop(0, E)
    def _(e):
        s = src_ref[e]
        t = trg_ref[e]
        sc = (ssrc_ref[pl.ds(s, 1), :] + strg_ref[pl.ds(t, 1), :]
              + srev_ref[pl.ds(e, 1), :])
        sc = jnp.where(sc > 0, sc, 0.2 * sc)          # LeakyReLU(0.2)
        es = jnp.exp(sc - shift)
        exp_ref[pl.ds(e, 1), :] = es
        denom_ref[pl.ds(t, 1), :] += es

    # Pass 2: gather the denominator back per edge -> attention coefficients.
    @pl.loop(0, E)
    def _(e):
        t = trg_ref[e]
        att_ref[pl.ds(e, 1), :] = exp_ref[pl.ds(e, 1), :] / (
            denom_ref[pl.ds(t, 1), :] + 1e-16)

    # Head -> feature expansion: ONE small matmul covering both att and
    # att * scores_rev (replaces the two separate expand matmuls).
    a = att_ref[...]                                    # (E, NH)
    b = a * srev_ref[...]                               # (E, NH)
    full = jnp.dot(jnp.concatenate([a, b], axis=1), expand_ref[...],
                   preferred_element_type=jnp.float32)  # (E, 2*HF)
    af_ref[...] = full[:, :HF]
    bf_ref[...] = full[:, HF:]

    # Pass 3: gather projected src features, weight, scatter-add into trg rows.
    @pl.loop(0, E)
    def _(e):
        s = src_ref[e]
        t = trg_ref[e]
        out_ref[pl.ds(t, 1), :] += (af_ref[pl.ds(e, 1), :]
                                    * proj_ref[pl.ds(s, 1), :]
                                    + bf_ref[pl.ds(e, 1), :])

    # Skip connection (skip_proj path), bias, ELU.
    o = out_ref[...] + skip_ref[...] + bias_ref[...]
    out_ref[...] = jnp.where(o > 0, o, jnp.exp(jnp.minimum(o, 0.0)) - 1.0)


def gat_forward(x, rev, edge_index, params, num_heads, f_out, row_tile=128):
    """Returns (out_nodes_features, review_features, edge_index) like the module."""
    N, FIN = x.shape
    E = edge_index.shape[1]
    NH, FOUT = num_heads, f_out
    HF = NH * FOUT
    f32 = jnp.float32

    W = params["W"]          # (FIN, HF) == linear_proj.weight.T
    Wskip = params["Wskip"]  # (FIN, HF) == skip_proj.weight.T
    bias = params["bias"].reshape(1, HF).astype(f32)

    # --- fused weights ------------------------------------------------------
    wcat = jnp.concatenate([W, Wskip], axis=1).astype(jnp.bfloat16)  # (FIN, 2HF)

    # scoring_fn (1, NH, FOUT) -> block-diagonal (HF, NH) so that
    # proj @ A == (proj.view(N, NH, FOUT) * scoring).sum(-1)
    eye = jnp.eye(NH, dtype=f32)

    def scoring_to_mat(s):
        return (s[0][:, :, None] * eye[:, None, :]).reshape(HF, NH)

    acat = jnp.concatenate(
        [scoring_to_mat(params["a_src"]),
         scoring_to_mat(params["a_trg"]),
         scoring_to_mat(params["a_rev"])], axis=1)                   # (HF, 3NH)
    # zero rows for the skip half so the kernel can multiply the full [proj|skip]
    acat_pad = jnp.concatenate([acat, jnp.zeros((HF, 3 * NH), f32)], axis=0)

    # --- kernel 1: fused projection over stacked [x ; rev] rows -------------
    R = N + E
    Rp = _pad_rows(R, row_tile)
    xr = jnp.zeros((Rp, FIN), f32).at[:N].set(x).at[N:R].set(rev)
    xr = xr.astype(jnp.bfloat16)

    cost1 = pl.CostEstimate(
        flops=2 * Rp * FIN * 2 * HF + 2 * Rp * 2 * HF * 3 * NH,
        transcendentals=0,
        bytes_accessed=int(xr.size) * 2 + int(wcat.size) * 2
        + int(acat_pad.size) * 4 + Rp * 2 * HF * 4 + Rp * 3 * NH * 4)

    P, S = pl.pallas_call(
        proj_kernel,
        out_shape=(jax.ShapeDtypeStruct((Rp, 2 * HF), f32),
                   jax.ShapeDtypeStruct((Rp, 3 * NH), f32)),
        grid=(Rp // row_tile,),
        in_specs=[pl.BlockSpec((row_tile, FIN), lambda i: (i, 0)),
                  pl.BlockSpec((FIN, 2 * HF), lambda i: (0, 0)),
                  pl.BlockSpec((2 * HF, 3 * NH), lambda i: (0, 0))],
        out_specs=(pl.BlockSpec((row_tile, 2 * HF), lambda i: (i, 0)),
                   pl.BlockSpec((row_tile, 3 * NH), lambda i: (i, 0))),
        compiler_params=pltpu.CompilerParams(
            dimension_semantics=("parallel",)),
        cost_estimate=cost1,
    )(xr, wcat, acat_pad)

    proj = P[:N, :HF]               # x @ W
    skip = P[:N, HF:]               # x @ Wskip
    ssrc = S[:N, 0 * NH:1 * NH]
    strg = S[:N, 1 * NH:2 * NH]
    srev = S[N:R, 2 * NH:3 * NH]

    # --- kernel 2: edge gather / softmax / scatter ---------------------------
    src = edge_index[0].astype(jnp.int32)   # (E,) -> SMEM
    trg = edge_index[1].astype(jnp.int32)   # (E,) -> SMEM

    # head -> feature replication, block diagonal for [att | att*srev]
    head_of_col = jnp.arange(HF, dtype=jnp.int32) // FOUT
    rep = (head_of_col[None, :] == jnp.arange(NH, dtype=jnp.int32)[:, None]
           ).astype(f32)                                  # (NH, HF)
    z = jnp.zeros((NH, HF), f32)
    expand = jnp.concatenate(
        [jnp.concatenate([rep, z], axis=1),
         jnp.concatenate([z, rep], axis=1)], axis=0)      # (2NH, 2HF)

    smem = pl.BlockSpec(memory_space=pltpu.MemorySpace.SMEM)
    vmem = pl.BlockSpec(memory_space=pltpu.MemorySpace.VMEM)

    vmem_need = (_vmem_bytes((N, HF)) * 3        # proj, skip, out
                 + _vmem_bytes((N, NH)) * 3      # ssrc, strg, denom
                 + _vmem_bytes((E, NH)) * 3      # srev, exp, att
                 + _vmem_bytes((E, HF)) * 2      # expanded att / att*srev
                 + _vmem_bytes((1, HF)) + _vmem_bytes((2 * NH, 2 * HF)))
    vmem_limit = int(min(2 * vmem_need + (16 << 20), 64 << 20))

    cost2 = pl.CostEstimate(
        flops=2 * E * 2 * NH * 2 * HF + 12 * E * NH + 6 * E * HF + 6 * N * HF,
        transcendentals=E * NH + N * HF,
        bytes_accessed=int(vmem_need) + 2 * E * 4)

    out = pl.pallas_call(
        edge_kernel,
        out_shape=jax.ShapeDtypeStruct((N, HF), f32),
        in_specs=[smem, smem] + [vmem] * 7,
        out_specs=vmem,
        scratch_shapes=[pltpu.VMEM((E, NH), f32),   # exp(scores)
                        pltpu.VMEM((E, NH), f32),   # attention coefficients
                        pltpu.VMEM((E, HF), f32),   # att expanded to HF
                        pltpu.VMEM((E, HF), f32),   # att*srev expanded to HF
                        pltpu.VMEM((N, NH), f32)],  # softmax denominators
        compiler_params=pltpu.CompilerParams(vmem_limit_bytes=vmem_limit),
        cost_estimate=cost2,
    )(src, trg, proj, skip, ssrc, strg, srev, bias, expand)

    return out, rev, edge_index


def gat_reference(x, rev, edge_index, params, NH, FOUT):
    """Pure-JAX reference mirroring the PyTorch forward (eval mode).

    Matmul inputs are cast to bf16 (with f32 accumulation) to mirror the
    kernel's MXU precision choice; everything else stays f32.
    """
    N, _ = x.shape
    HF = NH * FOUT
    xb, rb = x.astype(jnp.bfloat16), rev.astype(jnp.bfloat16)
    Wb = params["W"].astype(jnp.bfloat16)
    Wsb = params["Wskip"].astype(jnp.bfloat16)
    proj = jnp.dot(xb, Wb, preferred_element_type=jnp.float32).reshape(N, NH, FOUT)
    rproj = jnp.dot(rb, Wb, preferred_element_type=jnp.float32).reshape(-1, NH, FOUT)
    skip = jnp.dot(xb, Wsb, preferred_element_type=jnp.float32).reshape(N, NH, FOUT)
    s_src = jnp.sum(proj * params["a_src"], axis=-1)
    s_trg = jnp.sum(proj * params["a_trg"], axis=-1)
    s_rev = jnp.sum(rproj * params["a_rev"], axis=-1)
    src, trg = edge_index[0], edge_index[1]
    sc = s_src[src] + s_trg[trg] + s_rev
    sc = jnp.where(sc > 0, sc, 0.2 * sc)
    sc = sc - sc.max()
    ex = jnp.exp(sc)
    denom = jax.ops.segment_sum(ex, trg, num_segments=N)[trg]
    att = (ex / (denom + 1e-16))[..., None]
    weighted = proj[src] * att + s_rev[..., None] * att
    out = jax.ops.segment_sum(weighted, trg, num_segments=N)
    out = (out + skip).reshape(N, HF) + params["bias"]
    return jnp.where(out > 0, out, jnp.exp(jnp.minimum(out, 0.0)) - 1.0)


if __name__ == "__main__":
    N, FIN, NH, FOUT, E = 16, 16, 4, 8, 32
    HF = NH * FOUT

    key = jax.random.PRNGKey(0)
    ks = jax.random.split(key, 9)
    x = jax.random.normal(ks[0], (N, FIN), jnp.float32)
    rev = jax.random.normal(ks[1], (E, FIN), jnp.float32)
    src_ids = jax.random.randint(ks[2], (E,), 0, N)
    trg_ids = jax.random.randint(ks[3], (E,), 0, N)
    edge_index = jnp.stack([src_ids, trg_ids]).astype(jnp.int32)   # (2, E)

    def xavier(k, shape, fan_in, fan_out):
        bound = (6.0 / (fan_in + fan_out)) ** 0.5
        return jax.random.uniform(k, shape, jnp.float32, -bound, bound)

    params = dict(
        W=xavier(ks[4], (FIN, HF), FIN, HF),              # linear_proj.weight.T
        Wskip=xavier(ks[5], (FIN, HF), FIN, HF),          # skip_proj.weight.T
        a_src=xavier(ks[6], (1, NH, FOUT), NH * FOUT, FOUT),
        a_trg=xavier(ks[7], (1, NH, FOUT), NH * FOUT, FOUT),
        a_rev=xavier(ks[8], (1, NH, FOUT), NH * FOUT, FOUT),
        bias=jnp.zeros((HF,), jnp.float32),               # init_params zeros bias
    )

    out, rev_out, ei_out = gat_forward(x, rev, edge_index, params, NH, FOUT)
    out = jax.block_until_ready(out)

    ref = gat_reference(x, rev, edge_index, params, NH, FOUT)
    assert out.shape == (N, HF)
    err = float(jnp.max(jnp.abs(out - ref)))
    assert jnp.allclose(out, ref, atol=1e-3, rtol=1e-3), err

    print("KERNEL_OK")
</pallas_src>

<mosaic_0001>
module attributes {stable_mosaic.version = 11 : i64} {
  func.func @proj_kernel(%arg0: i32, %arg1: memref<128x16xbf16, #tpu.memory_space<vmem>>, %arg2: memref<16x64xbf16, #tpu.memory_space<vmem>>, %arg3: memref<64x12xf32, #tpu.memory_space<vmem>>, %arg4: memref<128x64xf32, #tpu.memory_space<vmem>>, %arg5: memref<128x12xf32, #tpu.memory_space<vmem>>) attributes {dimension_semantics = [#tpu.dimension_semantics<parallel>], iteration_bounds = array<i64: 1>, scalar_prefetch = 0 : i64, scratch_operands = 0 : i64, tpu.core_type = #tpu.core_type<tc>, window_params = [{transform_indices = @transform_0, window_bounds = array<i64: 128, 16>}, {pipeline_mode = #tpu.pipeline_mode<synchronous>, transform_indices = @transform_1, window_bounds = array<i64: 16, 64>}, {pipeline_mode = #tpu.pipeline_mode<synchronous>, transform_indices = @transform_2, window_bounds = array<i64: 64, 12>}, {transform_indices = @transform_3, window_bounds = array<i64: 128, 64>}, {transform_indices = @transform_4, window_bounds = array<i64: 128, 12>}]} {
    %c0 = arith.constant 0 : index
    %c0_0 = arith.constant 0 : index
    %0 = vector.load %arg1[%c0, %c0_0] : memref<128x16xbf16, #tpu.memory_space<vmem>>, vector<128x16xbf16>
    %c0_1 = arith.constant 0 : index
    %c0_2 = arith.constant 0 : index
    %1 = vector.load %arg2[%c0_1, %c0_2] : memref<16x64xbf16, #tpu.memory_space<vmem>>, vector<16x64xbf16>
    %cst = arith.constant dense<0.000000e+00> : vector<128x64xf32>
    %2 = tpu.matmul %0, %1, %cst {dimension_numbers = #tpu.dot_dimension_numbers<[1], [0], [0], [1], [0, 0, 1, 1], [], []>} : vector<128x16xbf16>, vector<16x64xbf16>, vector<128x64xf32> -> vector<128x64xf32>
    %c0_3 = arith.constant 0 : index
    %c0_4 = arith.constant 0 : index
    %3 = vector.load %arg4[%c0_3, %c0_4] : memref<128x64xf32, #tpu.memory_space<vmem>>, vector<128x64xf32>
    tpu.vector_store %arg4[%c0_3, %c0_4], %2 {strides = array<i32>} : memref<128x64xf32, #tpu.memory_space<vmem>>, vector<128x64xf32>,
    %c0_5 = arith.constant 0 : index
    %c0_6 = arith.constant 0 : index
    %4 = vector.load %arg3[%c0_5, %c0_6] : memref<64x12xf32, #tpu.memory_space<vmem>>, vector<64x12xf32>
    %cst_7 = arith.constant dense<0.000000e+00> : vector<128x12xf32>
    %5 = tpu.matmul %2, %4, %cst_7 {dimension_numbers = #tpu.dot_dimension_numbers<[1], [0], [0], [1], [0, 0, 1, 1], [], []>} : vector<128x64xf32>, vector<64x12xf32>, vector<128x12xf32> -> vector<128x12xf32>
    %c0_8 = arith.constant 0 : index
    %c0_9 = arith.constant 0 : index
    %6 = vector.load %arg5[%c0_8, %c0_9] : memref<128x12xf32, #tpu.memory_space<vmem>>, vector<128x12xf32>
    tpu.vector_store %arg5[%c0_8, %c0_9], %5 {strides = array<i32>} : memref<128x12xf32, #tpu.memory_space<vmem>>, vector<128x12xf32>,
    return
  }
  func.func @transform_0(%arg0: i32) -> (i32, i32) {
    %c0_i32 = arith.constant 0 : i32
    %c0_i32_0 = arith.constant 0 : i32
    return %arg0, %c0_i32 : i32, i32
  }
  func.func @transform_1(%arg0: i32) -> (i32, i32) {
    %c0_i32 = arith.constant 0 : i32
    %c0_i32_0 = arith.constant 0 : i32
    %c0_i32_1 = arith.constant 0 : i32
    return %c0_i32, %c0_i32_0 : i32, i32
  }
  func.func @transform_2(%arg0: i32) -> (i32, i32) {
    %c0_i32 = arith.constant 0 : i32
    %c0_i32_0 = arith.constant 0 : i32
    %c0_i32_1 = arith.constant 0 : i32
    return %c0_i32, %c0_i32_0 : i32, i32
  }
  func.func @transform_3(%arg0: i32) -> (i32, i32) {
    %c0_i32 = arith.constant 0 : i32
    %c0_i32_0 = arith.constant 0 : i32
    return %arg0, %c0_i32 : i32, i32
  }
  func.func @transform_4(%arg0: i32) -> (i32, i32) {
    %c0_i32 = arith.constant 0 : i32
    %c0_i32_0 = arith.constant 0 : i32
    return %arg0, %c0_i32 : i32, i32
  }
}

</mosaic_0001>

<bundles_post_ra>
// kernel: tpu_custom_call.1
= control target key start
LH: loop header
LB: loop body
LE: loop exit
PB: predicated region body
PF: predicated region fallthrough
CT: control target
= control target key end

     0   :  { %vm81_vm0 = vcmask 130048   ;;  %vm203_vm1 = vcmask 523264   ;;  %vm421_vm2 = vcmask 97280   ;;  %s831_s1 = inlined_call_operand.vmem [shape: bf16[16,64], index: 1, kind: input, shape index: {}]   ;;  %s832_s0 = inlined_call_operand.vmem [shape: bf16[128,16], index: 0, kind: input, shape index: {}]   ;;  %s833_s2 = inlined_call_operand.vmem [shape: f32[64,12], index: 2, kind: input, shape index: {}]   ;;  %s834_s3 = inlined_call_operand.vmem [shape: f32[128,64], index: 3, kind: output, shape index: {0}]   ;;  %s835_s4 = inlined_call_operand.vmem [shape: f32[128,12], index: 4, kind: output, shape index: {1}]  }
   0x1   :  { %v594_v0 = vld [vmem:[%s831_s1] sm:$0xff]   ;;  %v596_v2 = vld [vmem:[%s832_s0 + $0x8] sm:$0xff]   ;;  %v597_v3 = vld [vmem:[%s832_s0 + $0x10] sm:$0xff]  }
   0x2   :  { %v595_v1 = vld [vmem:[%s832_s0] sm:$0xff]   ;;  %512 = vmatprep.subr.bf16.mxu0 %v594_v0  ;;  %v221_v5 = vld [vmem:[%s833_s2 + $0x8] sm:$0xff]  ;;  %v222_v6 = vld [vmem:[%s833_s2 + $0x10] sm:$0xff] }
   0x3   :  { %513 = vmatpush3.bf16.msra.mxu0 %v594_v0  ;;  %514 = vmatprep.mubr.msk.bf16.mxu0 %vm81_vm0, %v595_v1  ;;  %v220_v4 = vld [vmem:[%s833_s2] sm:$0xff]  ;;  %v598_v7 = vld [vmem:[%s832_s0 + $0x18] sm:$0xff]   ;;  %v225_v13 = vld [vmem:[%s833_s2 + $0x28] sm:$0xff] }
   0x4   :  { %v570_v8 = vpack.c.bf16 %v221_v5, %v220_v4  ;;  %v223_v9 = vld [vmem:[%s833_s2 + $0x18] sm:$0xff]  ;;  %v599_v10 = vld [vmem:[%s832_s0 + $0x20] sm:$0xff]   ;;  %v226_v15 = vld [vmem:[%s833_s2 + $0x30] sm:$0xff] }
   0x5   :  { %v574_v11 = vpack.c.bf16 %v223_v9, %v222_v6  ;;  %v224_v12 = vld [vmem:[%s833_s2 + $0x20] sm:$0xff]  ;;  %v227_v16 = vld [vmem:[%s833_s2 + $0x38] sm:$0xff]  ;;  %v600_v17 = vld [vmem:[%s832_s0 + $0x28] sm:$0xff]  }
   0x6   :  { %515 = vmatmul.mubr.msk.bf16.vlgmr.msra.gmra.mrb[0].mxu0 %vm81_vm0, %v596_v2  ;;  %586 = vmatprep.subr.bf16.mxu1 %v570_v8  ;;  %v578_v14 = vpack.c.bf16 %v225_v13, %v224_v12  ;;  %v582_v18 = vpack.c.bf16 %v227_v16, %v226_v15  ;;  %v601_v19 = vld [vmem:[%s832_s0 + $0x30] sm:$0xff]   ;;  %v602_v20 = vld [vmem:[%s832_s0 + $0x38] sm:$0xff]  }
   0x7   :  { %518 = vmatprep.mubr.msk.bf16.mxu0 %vm81_vm0, %v597_v3  ;;  %571 = vmatprep.subr.bf16.mxu0 %v570_v8 }
   0x8   :  { %590 = vmatpush3.bf16.msra.mxu1 %v570_v8  ;;  %573 = vmatpush3.bf16.msra.mxu0 %v570_v8 }
   0x9   :  { %587 = vmatprep.subr.bf16.mxu1 %v574_v11  ;;  %575 = vmatprep.subr.bf16.mxu0 %v574_v11 }
   0xc   :  { %591 = vmatpush3.bf16.msra.mxu1 %v574_v11  ;;  %577 = vmatpush3.bf16.msra.mxu0 %v574_v11 }
   0xd   :  { %588 = vmatprep.subr.bf16.mxu1 %v578_v14  ;;  %579 = vmatprep.subr.bf16.mxu0 %v578_v14 }
   0xe   :  { %519 = vmatmul.mubr.msk.bf16.gmra.mrb[4].mxu0 %vm81_vm0, %v598_v7 }
   0xf   :  { %522 = vmatprep.mubr.msk.bf16.mxu0 %vm81_vm0, %v599_v10 }
  0x10   :  { %592 = vmatpush3.bf16.msra.mxu1 %v578_v14  ;;  %581 = vmatpush3.bf16.msra.mxu0 %v578_v14 }
  0x11   :  { %589 = vmatprep.subr.bf16.mxu1 %v582_v18  ;;  %583 = vmatprep.subr.bf16.mxu0 %v582_v18 }
  0x14   :  { %593 = vmatpush3.bf16.msra.mxu1 %v582_v18  ;;  %585 = vmatpush3.bf16.msra.mxu0 %v582_v18 }
  0x16   :  { %523 = vmatmul.mubr.msk.bf16.gmra.mrb[8].mxu0 %vm81_vm0, %v600_v17 }
  0x17   :  { %526 = vmatprep.mubr.msk.bf16.mxu0 %vm81_vm0, %v601_v19 }
  0x1e   :  { %527 = vmatmul.mubr.msk.bf16.gmra.mrb[12].mxu0 %vm81_vm0, %v602_v20 }
  0xd9   :  { %v516_v21 = vpop.f32.mrb[0].mxu0 }
  0xda   :  { %206 = vst.msk [vmem:[%s834_s3 + $0x10] sm:$0xff] %vm203_vm1, %v516_v21  ;;  %v140_v22 = vpop.f32.mrb[1].mxu0  ;;  %549 = vmatprep.mubr.msk.f32.mxu1 %vm203_vm1, %v516_v21 }
  0xdb   :  { %204 = vst.msk [vmem:[%s834_s3] sm:$0xff] %vm203_vm1, %v140_v22  ;;  %v517_v23 = vpop.f32.mrb[2].mxu0  ;;  %546 = vmatprep.mubr.msk.f32.mxu0 %vm203_vm1, %v140_v22 }
  0xdc   :  { %207 = vst.msk [vmem:[%s834_s3 + $0x18] sm:$0xff] %vm203_vm1, %v517_v23  ;;  %v143_v24 = vpop.f32.mrb[3].mxu0  ;;  %550 = vmatmul.mubr.msk.f32.vlgmr.msra.gmra.mrb[0].mxu1 %vm203_vm1, %v517_v23 }
  0xdd   :  { %205 = vst.msk [vmem:[%s834_s3 + $0x8] sm:$0xff] %vm203_vm1, %v143_v24  ;;  %547 = vmatmul.mubr.msk.f32.vlgmr.msra.gmra.mrb[16].mxu0 %vm203_vm1, %v143_v24 }
  0xe1   :  { %v520_v25 = vpop.f32.mrb[4].mxu0 }
  0xe2   :  { %210 = vst.msk [vmem:[%s834_s3 + $0x30] sm:$0xff] %vm203_vm1, %v520_v25  ;;  %v156_v26 = vpop.f32.mrb[5].mxu0 }
  0xe3   :  { %208 = vst.msk [vmem:[%s834_s3 + $0x20] sm:$0xff] %vm203_vm1, %v156_v26  ;;  %v521_v27 = vpop.f32.mrb[6].mxu0  ;;  %552 = vmatprep.mubr.msk.f32.mxu1 %vm203_vm1, %v156_v26 }
  0xe4   :  { %211 = vst.msk [vmem:[%s834_s3 + $0x38] sm:$0xff] %vm203_vm1, %v521_v27  ;;  %v159_v28 = vpop.f32.mrb[7].mxu0 }
  0xe5   :  { %209 = vst.msk [vmem:[%s834_s3 + $0x28] sm:$0xff] %vm203_vm1, %v159_v28  ;;  %553 = vmatmul.mubr.msk.f32.gmra.mrb[2].mxu1 %vm203_vm1, %v159_v28 }
  0xe6   :  { %555 = vmatprep.mubr.msk.f32.mxu1 %vm203_vm1, %v520_v25 }
  0xe9   :  { %v524_v29 = vpop.f32.mrb[8].mxu0  ;;  %556 = vmatmul.mubr.msk.f32.gmra.mrb[4].mxu1 %vm203_vm1, %v521_v27 }
  0xea   :  { %214 = vst.msk [vmem:[%s834_s3 + $0x50] sm:$0xff] %vm203_vm1, %v524_v29  ;;  %v172_v30 = vpop.f32.mrb[9].mxu0 }
  0xeb   :  { %212 = vst.msk [vmem:[%s834_s3 + $0x40] sm:$0xff] %vm203_vm1, %v172_v30  ;;  %v525_v31 = vpop.f32.mrb[10].mxu0  ;;  %558 = vmatprep.mubr.msk.f32.mxu1 %vm203_vm1, %v172_v30 }
  0xec   :  { %215 = vst.msk [vmem:[%s834_s3 + $0x58] sm:$0xff] %vm203_vm1, %v525_v31  ;;  %v175_v32 = vpop.f32.mrb[11].mxu0 }
  0xed   :  { %213 = vst.msk [vmem:[%s834_s3 + $0x48] sm:$0xff] %vm203_vm1, %v175_v32  ;;  %559 = vmatmul.mubr.msk.f32.gmra.mrb[6].mxu1 %vm203_vm1, %v175_v32 }
  0xee   :  { %561 = vmatprep.mubr.msk.f32.mxu1 %vm203_vm1, %v524_v29 }
  0xf1   :  { %v528_v33 = vpop.f32.mrb[12].mxu0  ;;  %562 = vmatmul.mubr.msk.f32.gmra.mrb[8].mxu1 %vm203_vm1, %v525_v31 }
  0xf2   :  { %218 = vst.msk [vmem:[%s834_s3 + $0x70] sm:$0xff] %vm203_vm1, %v528_v33  ;;  %v188_v34 = vpop.f32.mrb[13].mxu0 }
  0xf3   :  { %216 = vst.msk [vmem:[%s834_s3 + $0x60] sm:$0xff] %vm203_vm1, %v188_v34  ;;  %v529_v35 = vpop.f32.mrb[14].mxu0  ;;  %564 = vmatprep.mubr.msk.f32.mxu1 %vm203_vm1, %v188_v34 }
  0xf4   :  { %219 = vst.msk [vmem:[%s834_s3 + $0x78] sm:$0xff] %vm203_vm1, %v529_v35  ;;  %v191_v36 = vpop.f32.mrb[15].mxu0 }
  0xf5   :  { %217 = vst.msk [vmem:[%s834_s3 + $0x68] sm:$0xff] %vm203_vm1, %v191_v36  ;;  %565 = vmatmul.mubr.msk.f32.gmra.mrb[10].mxu1 %vm203_vm1, %v191_v36 }
  0xf6   :  { %567 = vmatprep.mubr.msk.f32.mxu1 %vm203_vm1, %v528_v33 }
  0xf9   :  { %568 = vmatmul.mubr.msk.f32.gmra.mrb[12].mxu1 %vm203_vm1, %v529_v35 }
 0x1af   :  { %v551_v37 = vpop.f32.mrb[0].mxu1 }
 0x1b0   :  { %425 = vst.msk [vmem:[%s835_s4 + $0x18] sm:$0xff] %vm421_vm2, %v551_v37  ;;  %v548_v38 = vpop.f32.mrb[16].mxu0  ;;  %v352_v39 = vpop.f32.mrb[1].mxu1 }
 0x1b1   :  { %423 = vst.msk [vmem:[%s835_s4 + $0x8] sm:$0xff] %vm421_vm2, %v548_v38  ;;  %424 = vst.msk [vmem:[%s835_s4 + $0x10] sm:$0xff] %vm421_vm2, %v352_v39  ;;  %v342_v40 = vpop.f32.mrb[17].mxu0 }
 0x1b2   :  { %422 = vst.msk [vmem:[%s835_s4] sm:$0xff] %vm421_vm2, %v342_v40 }
 0x1b8   :  { %v554_v41 = vpop.f32.mrb[2].mxu1 }
 0x1b9   :  { %427 = vst.msk [vmem:[%s835_s4 + $0x28] sm:$0xff] %vm421_vm2, %v554_v41  ;;  %v362_v42 = vpop.f32.mrb[3].mxu1 }
 0x1ba   :  { %426 = vst.msk [vmem:[%s835_s4 + $0x20] sm:$0xff] %vm421_vm2, %v362_v42 }
 0x1bc   :  { %v557_v43 = vpop.f32.mrb[4].mxu1 }
 0x1bd   :  { %429 = vst.msk [vmem:[%s835_s4 + $0x38] sm:$0xff] %vm421_vm2, %v557_v43  ;;  %v372_v44 = vpop.f32.mrb[5].mxu1 }
 0x1be   :  { %428 = vst.msk [vmem:[%s835_s4 + $0x30] sm:$0xff] %vm421_vm2, %v372_v44 }
 0x1c0   :  { %v560_v45 = vpop.f32.mrb[6].mxu1 }
 0x1c1   :  { %431 = vst.msk [vmem:[%s835_s4 + $0x48] sm:$0xff] %vm421_vm2, %v560_v45  ;;  %v382_v46 = vpop.f32.mrb[7].mxu1 }
 0x1c2   :  { %430 = vst.msk [vmem:[%s835_s4 + $0x40] sm:$0xff] %vm421_vm2, %v382_v46 }
 0x1c4   :  { %v563_v47 = vpop.f32.mrb[8].mxu1 }
 0x1c5   :  { %433 = vst.msk [vmem:[%s835_s4 + $0x58] sm:$0xff] %vm421_vm2, %v563_v47  ;;  %v392_v48 = vpop.f32.mrb[9].mxu1 }
 0x1c6   :  { %432 = vst.msk [vmem:[%s835_s4 + $0x50] sm:$0xff] %vm421_vm2, %v392_v48 }
 0x1c8   :  { %v566_v49 = vpop.f32.mrb[10].mxu1 }
 0x1c9   :  { %435 = vst.msk [vmem:[%s835_s4 + $0x68] sm:$0xff] %vm421_vm2, %v566_v49  ;;  %v402_v50 = vpop.f32.mrb[11].mxu1 }
 0x1ca   :  { %434 = vst.msk [vmem:[%s835_s4 + $0x60] sm:$0xff] %vm421_vm2, %v402_v50 }
 0x1cc   :  { %v569_v51 = vpop.f32.mrb[12].mxu1 }
 0x1cd   :  { %437 = vst.msk [vmem:[%s835_s4 + $0x78] sm:$0xff] %vm421_vm2, %v569_v51  ;;  %v412_v52 = vpop.f32.mrb[13].mxu1 }
 0x1ce   :  { %436 = vst.msk [vmem:[%s835_s4 + $0x70] sm:$0xff] %vm421_vm2, %v412_v52 }

</bundles_post_ra>
